<compile_context>
chip_gen: v6e
topology: v6e:2x2x1
jax: 0.10.0
libtpu: 0.0.40
codegen_flags: <defaults>
</compile_context>

<pallas_src>
import jax
import jax.numpy as jnp
from jax.experimental import pallas as pl
from jax.experimental.pallas import tpu as pltpu

LANE = 128                 # TPU lane width (last dim of every tile)
ROW_ALIGN = 8              # sublane alignment for the row dimension
MAX_BLOCK_ROWS = 4096      # (4096, 128) f32 = 2 MiB per buffer
SMALL_N_FASTPATH = 16384   # below this, fused XLA elementwise beats pallas dispatch


def linear_kernel(w_ref, b_ref, x_ref, o_ref):
    # w_ref, b_ref: (1,) f32 scalars in SMEM.
    # x_ref, o_ref: (tm, 128) f32 tiles in VMEM.
    # Pure VPU scale-and-shift; no MXU involvement.
    o_ref[...] = x_ref[...] * w_ref[0] + b_ref[0]


def _round_up(x, m):
    return ((x + m - 1) // m) * m


def linear_forward(x, weight, bias, *, min_pallas_elements=SMALL_N_FASTPATH):
    """Pallas equivalent of torch.nn.Linear(1, 1) forward.

    x:      any float array whose last dim == 1 (e.g. (N, 1)), or shape (1,)
            like `torch.tensor([4.0])`.
    weight: (1, 1) float32   (out_features, in_features)
    bias:   (1,)   float32
    returns array with the same shape as x (out_features == in_features == 1).
    """
    assert x.shape[-1] == 1, "in_features must be 1"
    orig_shape = x.shape

    w = weight.reshape(()).astype(jnp.float32)
    b = bias.reshape(()).astype(jnp.float32)
    x_f32 = x.astype(jnp.float32)
    n = x_f32.size
    assert n > 0

    # Small-input fast path: custom-call dispatch + padding would dominate by
    # orders of magnitude; a single fused XLA elementwise op is strictly faster.
    if n < min_pallas_elements:
        return (x_f32 * w + b).reshape(orig_shape)

    x_flat = x_f32.reshape(-1)

    # Lane-dense layout: (rows, 128) with rows a multiple of 8. Only pad (one
    # extra HBM pass) when the element count is not already (8*128)-aligned.
    rows = _round_up(pl.cdiv(n, LANE), ROW_ALIGN)
    total = rows * LANE
    padded = total != n
    if padded:
        x_flat = jnp.pad(x_flat, (0, total - n))
    x2d = x_flat.reshape(rows, LANE)

    # Tile rows: up to 2 MiB per buffer to amortize per-step overhead, but keep
    # >= ~8 grid blocks for large inputs so v7x's two TensorCores both stream
    # and DMA stays hidden behind compute. Partial last block handled by cdiv.
    tm = min(MAX_BLOCK_ROWS, max(ROW_ALIGN, _round_up(pl.cdiv(rows, 8), ROW_ALIGN)))
    grid = (pl.cdiv(rows, tm),)

    w_sm = w.reshape(1)   # scalar in SMEM
    b_sm = b.reshape(1)   # scalar in SMEM

    out2d = pl.pallas_call(
        linear_kernel,
        out_shape=jax.ShapeDtypeStruct((rows, LANE), jnp.float32),
        grid=grid,
        in_specs=[
            pl.BlockSpec(memory_space=pltpu.MemorySpace.SMEM),  # weight scalar
            pl.BlockSpec(memory_space=pltpu.MemorySpace.SMEM),  # bias scalar
            pl.BlockSpec((tm, LANE), lambda i: (i, 0)),          # x tile
        ],
        out_specs=pl.BlockSpec((tm, LANE), lambda i: (i, 0)),
        compiler_params=pltpu.CompilerParams(
            dimension_semantics=("parallel",),
        ),
        cost_estimate=pl.CostEstimate(
            flops=2 * total,
            transcendentals=0,
            bytes_accessed=2 * total * 4,
        ),
    )(w_sm, b_sm, x2d)

    out_flat = out2d.reshape(-1)
    if padded:
        out_flat = out_flat[:n]   # drop padding only when it was added
    return out_flat.reshape(orig_shape)


if __name__ == "__main__":
    key = jax.random.PRNGKey(0)
    kw, kb, kx1, kx2 = jax.random.split(key, 4)

    # Deterministic params, same shapes as torch.nn.Linear(1, 1).
    weight = jax.random.uniform(kw, (1, 1), jnp.float32, minval=-1.0, maxval=1.0)
    bias = jax.random.uniform(kb, (1,), jnp.float32, minval=-1.0, maxval=1.0)

    # Mirrors `t = torch.tensor([4.0]); y_pred = model(t)` -> output shape (1,).
    # Tiny input goes through the fast path (plain fused elementwise).
    t = jnp.array([4.0], dtype=jnp.float32)
    y_pred = jax.block_until_ready(linear_forward(t, weight, bias))
    y_ref = t * weight[0, 0] + bias[0]
    assert y_pred.shape == (1,)
    assert jnp.allclose(y_pred, y_ref, atol=1e-6), (y_pred, y_ref)

    # Lane-aligned batch -> Pallas kernel path, zero-copy wrapper (no pad/slice).
    x1 = jax.random.normal(kx1, (65536, 1), jnp.float32)
    y1 = jax.block_until_ready(linear_forward(x1, weight, bias))
    y1_ref = x1 @ weight.T + bias
    assert y1.shape == (65536, 1)
    assert jnp.allclose(y1, y1_ref, atol=1e-5, rtol=1e-5)

    # Non-aligned batch -> kernel path with minimal pad + partial last grid block.
    x2 = jax.random.normal(kx2, (20000, 1), jnp.float32)
    y2 = jax.block_until_ready(linear_forward(x2, weight, bias))
    y2_ref = x2 @ weight.T + bias
    assert y2.shape == (20000, 1)
    assert jnp.allclose(y2, y2_ref, atol=1e-5, rtol=1e-5)

    print("KERNEL_OK")
</pallas_src>

<mosaic_0001>
module attributes {stable_mosaic.version = 11 : i64} {
  func.func @linear_kernel(%arg0: i32, %arg1: memref<1xf32, #tpu.memory_space<smem>>, %arg2: memref<1xf32, #tpu.memory_space<smem>>, %arg3: memref<64x128xf32, #tpu.memory_space<vmem>>, %arg4: memref<64x128xf32, #tpu.memory_space<vmem>>) attributes {dimension_semantics = [#tpu.dimension_semantics<parallel>], iteration_bounds = array<i64: 8>, scalar_prefetch = 0 : i64, scratch_operands = 0 : i64, tpu.core_type = #tpu.core_type<tc>, window_params = [{transform_indices = @transform_0, window_bounds = array<i64: 1>}, {transform_indices = @transform_1, window_bounds = array<i64: 1>}, {transform_indices = @transform_2, window_bounds = array<i64: 64, 128>}, {transform_indices = @transform_3, window_bounds = array<i64: 64, 128>}]} {
    %c0 = arith.constant 0 : index
    %c0_0 = arith.constant 0 : index
    %0 = vector.load %arg3[%c0, %c0_0] : memref<64x128xf32, #tpu.memory_space<vmem>>, vector<64x128xf32>
    %c0_1 = arith.constant 0 : index
    %1 = memref.load %arg1[%c0_1] : memref<1xf32, #tpu.memory_space<smem>>
    %2 = vector.broadcast %1 : f32 to vector<64x128xf32>
    %3 = arith.mulf %0, %2 : vector<64x128xf32>
    %c0_2 = arith.constant 0 : index
    %4 = memref.load %arg2[%c0_2] : memref<1xf32, #tpu.memory_space<smem>>
    %5 = vector.broadcast %4 : f32 to vector<64x128xf32>
    %6 = arith.addf %3, %5 : vector<64x128xf32>
    %c0_3 = arith.constant 0 : index
    %c0_4 = arith.constant 0 : index
    %7 = vector.load %arg4[%c0_3, %c0_4] : memref<64x128xf32, #tpu.memory_space<vmem>>, vector<64x128xf32>
    tpu.vector_store %arg4[%c0_3, %c0_4], %6 {strides = array<i32>} : memref<64x128xf32, #tpu.memory_space<vmem>>, vector<64x128xf32>,
    return
  }
  func.func @transform_0(%arg0: i32) -> i32 {
    %c0_i32 = arith.constant 0 : i32
    %c0_i32_0 = arith.constant 0 : i32
    return %c0_i32 : i32
  }
  func.func @transform_1(%arg0: i32) -> i32 {
    %c0_i32 = arith.constant 0 : i32
    %c0_i32_0 = arith.constant 0 : i32
    return %c0_i32 : i32
  }
  func.func @transform_2(%arg0: i32) -> (i32, i32) {
    %c0_i32 = arith.constant 0 : i32
    %c0_i32_0 = arith.constant 0 : i32
    return %arg0, %c0_i32 : i32, i32
  }
  func.func @transform_3(%arg0: i32) -> (i32, i32) {
    %c0_i32 = arith.constant 0 : i32
    %c0_i32_0 = arith.constant 0 : i32
    return %arg0, %c0_i32 : i32, i32
  }
}

</mosaic_0001>

<bundles_post_ra>
// kernel: tpu_custom_call.1
= control target key start
LH: loop header
LB: loop body
LE: loop exit
PB: predicated region body
PF: predicated region fallthrough
CT: control target
= control target key end

     0   :  { %s660_s0 = inlined_call_operand.<no memory space> [shape: f32[1], index: 0, kind: input, shape index: {}]   ;;  %s661_s1 = inlined_call_operand.<no memory space> [shape: f32[1], index: 1, kind: input, shape index: {}]   ;;  %s662_s2 = inlined_call_operand.hbm [shape: f32[512,128], index: 2, kind: input, shape index: {}]   ;;  %s663_s3 = inlined_call_operand.hbm [shape: f32[512,128], index: 3, kind: output, shape index: {}]  }
   0x1   :  { %8 = sst [smem:[#allocation2]] %s660_s0 }
   0x2   :  { %9 = sst [smem:[#allocation3]] %s661_s1 }
   0x3   :  { %10 = vsyncpa [#allocation5], 0 }
   0x4   :  { %12 = vsyncpa [#allocation5 + $0x1], 0 }
   0x5   :  { %13 = vsyncpa [#allocation6], 0 }
   0x6   :  { %15 = vsyncpa [#allocation6 + $0x1], 0  ;;  %s508_s16 = smov 0   ;;  %s510_s17 = smov 0  }
   0x7   :  { %s512_s18 = smov 0   ;;  %s514_s19 = smov 0  }
   0x8 LB: > { %s529_s0 = sadd.s32 4294967295, %s474_s19   ;;  %s316_s1 = sadd.s32 4294967294, %s474_s19   ;;  %s474_s19 = sphi %s514_s19, %s677_s19   ;;  %s470_s18 = sphi %s512_s18, %s676_s18   ;;  %s466_s17 = sphi %s510_s17, %s675_s17   ;;  %s462_s16 = sphi %s508_s16, %s674_s16  }
   0x9   : > { %s533_s20 = sadd.s32 1, %s474_s19   ;;  %s70_s21 = sadd.s32 1, %s470_s18 }
   0xa   : > { %s67_s22 = ssub.s32 %s474_s19, %s533_s20  ;;  %p77_p0 = scmp.ne.s32.totalorder %s470_s18, %s466_s17 }
   0xb   : > { %p68_p1 = scmp.eq.s32.totalorder %s67_s22, 0  ;;  %p78_p2 = scmp.eq.s32.totalorder %s474_s19, 0 }
   0xc   : > { %p83_p3 = scmp.ne.s32.totalorder %s466_s17, %s462_s16  ;;  %p84_p4 = scmp.eq.s32.totalorder %s529_s0, 0 }
   0xd   : > { %s545_s23 = scalar_select %p68_p1, %s470_s18, %s70_s21  }
   0xe   : > { %p547_p5 = por %p78_p2, %p77_p0  ;;  %p551_p6 = por %p84_p4, %p83_p3 }
   0xf   : > { %p107_p7 = scmp.eq.s32.totalorder %s529_s0, 7  ;;  %p113_p8 = scmp.eq.s32.totalorder %s316_s1, 7 }
  0x10   : > { %s667_s25 = scalar_select %p551_p6, 1, 0 }
  0x11   : > { %p344_p9 = scmp.lt.s32.totalorder %s474_s19, 8  ;;  %p557_p10 = por %p107_p7, %p77_p0 }
  0x12   : > { %p561_p11 = por %p113_p8, %p83_p3  ;;  %s139_s28 = sand.u32 1, %s470_s18  }
  0x13   : > { %s668_s26 = scalar_select %p557_p10, 1, 0 }
  0x14   : > { %s669_s27 = scalar_select %p561_p11, 1, 0 }
  0x15   : > { %s330_s29 = sshll.u32 %s474_s19, 10  ;;  %s319_s30 = sshll.u32 %s139_s28, 6 }
  0x16   : > { %s570_s6 = scalar_lea.hbm %s662_s2, %s330_s29  ;;  %s143_s7 = scalar_lea.vmem [#allocation4], %s319_s30 }
  0x17   : > { %s150_s8 = sshll.u32 %s143_s7, 4  ;;  %p574_p12 = pnand %p344_p9, %p547_p5  ;;  %s578_s8 = int_to_ptr.vmem [resolvable:$true] %s150_s8 }
  0x18   : > { %s580_s10 = scalar_lea.sflag [#allocation5], %s139_s28  ;;  %s382_s11 = scalar_lea.hbm %s570_s6, 1024 }
  0x19   : > { %p383_p13 = scmp.ne.s32.totalorder %s570_s6, %s382_s11  ;;  %p384_p0 = pneg %p574_p12 }
  0x1a   : > { %s387_s14 = scalar_lea.hbm %s662_s2, 8192  ;;  %p388_p3 = scmp.lt.s32.totalorder %s570_s6, %s662_s2 }
  0x1b   : > { %p385_p1 = pnand %p384_p0, %p383_p13  ;;  %p389_p4 = scmp.lt.s32.totalorder %s387_s14, %s382_s11 }
  0x1d   : > { %p386_p2 = pneg %p385_p1  ;;  %p390_p5 = por %p389_p4, %p388_p3 }
  0x1f   : > { %p391_p7 = pnand %p390_p5, %p386_p2 }
  0x21   : > { %394 = shalt.err (!%p391_p7)
}
  0x22   : > { %s395_s21 = scalar_lea.vmem %s578_s8, 1024  ;;  %s476_s22 = smov [#allocation4]  }
  0x23   : > { %p396_p8 = scmp.ne.s32.totalorder %s578_s8, %s395_s21  ;;  %s400_s24 = sshll.u32 %s476_s22, 4  ;;  %s401_s24 = int_to_ptr.vmem [resolvable:$false] %s400_s24 }
  0x24   : > { %s402_s28 = scalar_lea.vmem %s401_s24, 2048  ;;  %p403_p1 = scmp.lt.s32.totalorder %s578_s8, %s401_s24 }
  0x25   : > { %p398_p9 = pnand %p396_p8, %p384_p0  ;;  %p404_p11 = scmp.lt.s32.totalorder %s402_s28, %s395_s21 }
  0x27   : > { %p399_p13 = pneg %p398_p9  ;;  %p405_p10 = por %p404_p11, %p403_p1 }
  0x29   : > { %p406_p6 = pnand %p405_p10, %p399_p13 }
  0x2b   : > { %409 = shalt.err (!%p406_p6)
}
  0x2c   : > { %s477_s29 = smov 128   ;;  %s478_s30 = smov 8  }
  0x2d   : > { %339 = dma.hbm_to_vmem [thread:$0]  (!%p574_p12), %s570_s6, 1024, %s578_s8, %s580_s10, %s477_s29, %s477_s29, %s478_s30  }
  0x2e   : > { %p322_p0 = scmp.ge.s32.totalorder %s474_s19, 1  ;;  %p158_p2 = scmp.lt.s32.totalorder %s474_s19, 9 }
  0x30   : > { %p159_p3 = pnand %p322_p0, %p158_p2 }
  0x31   : > { %s604_s4 = sand.u32 (!%p159_p3), 1, %s466_s17   ;;  %p671_p6 = scmp.ne.s32.totalorder (!%p159_p3), %s667_s25, 0 }
  0x32   : > { %162 = sbr.rel (%p159_p3) target bundleno = 84 (0x54), region = 32  ;;  %s323_s5 = sshll.u32 (!%p159_p3), %s604_s4, 6 }
  0x33   : > { %s165_s7 = scalar_lea.sflag (!%p159_p3), [#allocation5], %s604_s4  ;;  %s168_s11 = scalar_lea.vmem (!%p159_p3), [#allocation4], %s323_s5 }
  0x37   : > { %453 = dma.done.wait (%p671_p6), %s165_s7, 1024  }
  0x38   : > { %455 = vsyncadd (%p671_p6), %s165_s7, 4294966272  ;;  %s201_s9 = sld [smem:[#allocation2]]  ;;  %v193_v0 = vld [vmem:[%s168_s11] sm:$0xff]  ;;  %v194_v2 = vld [vmem:[%s168_s11 + $0x8] sm:$0xff]  ;;  %s190_s8 = scalar_lea.vmem [#allocation7], %s323_s5 }
  0x39   : > { %s211_s6 = sld [smem:[#allocation3]]  ;;  %v195_v3 = vld [vmem:[%s168_s11 + $0x10] sm:$0xff]  ;;  %v196_v8 = vld [vmem:[%s168_s11 + $0x18] sm:$0xff]  ;;  %v197_v9 = vld [vmem:[%s168_s11 + $0x20] sm:$0xff]  ;;  %s243_s10 = sshll.u32 %s190_s8, 4  ;;  %s613_s10 = int_to_ptr.vmem [resolvable:$true] %s243_s10 }
  0x3a   : > { %v198_v10 = vld [vmem:[%s168_s11 + $0x28] sm:$0xff]  ;;  %v199_v14 = vld [vmem:[%s168_s11 + $0x30] sm:$0xff]  ;;  %v200_v15 = vld [vmem:[%s168_s11 + $0x38] sm:$0xff]  ;;  %s331_s25 = sshll.u32 %s529_s0, 10  ;;  %s230_s14 = scalar_lea.sflag [#allocation6], %s604_s4 }
  0x3b   : > { %s618_s13 = scalar_lea.hbm %s663_s3, %s331_s25  ;;  %s410_s15 = scalar_lea.vmem %s613_s10, 1024 }
  0x3c   : > { %p411_p10 = scmp.ne.s32.totalorder %s613_s10, %s410_s15  ;;  %p672_p11 = scmp.ne.s32.totalorder %s668_s26, 0 }
  0x3d   : > { %s479_s1 = smov [#allocation7]  }
  0x3e   : > { %v202_v1 = vstv %s201_s9  ;;  %p412_p12 = pnand %p411_p10, %p672_p11  ;;  %s414_s21 = sshll.u32 %s479_s1, 4  ;;  %s415_s21 = int_to_ptr.vmem [resolvable:$false] %s414_s21 }
  0x3f   : > { %v203_v4 = vmul.f32 %v202_v1, %v193_v0  ;;  %v212_v5 = vstv %s211_s6  ;;  %v204_v6 = vmul.f32 %v202_v1, %v194_v2  ;;  %v205_v7 = vmul.f32 %v202_v1, %v195_v3  ;;  %s416_s22 = scalar_lea.vmem %s415_s21, 2048  ;;  %p417_p5 = scmp.lt.s32.totalorder %s613_s10, %s415_s21 }
  0x40   : > { %v206_v11 = vmul.f32 %v202_v1, %v196_v8  ;;  %v207_v12 = vmul.f32 %v202_v1, %v197_v9  ;;  %v208_v13 = vmul.f32 %v202_v1, %v198_v10  ;;  %v209_v19 = vmul.f32 %v202_v1, %v199_v14  ;;  %p413_p4 = pneg %p412_p12  ;;  %p418_p7 = scmp.lt.s32.totalorder %s416_s22, %s410_s15 }
  0x41   : > { %v213_v16 = vadd.f32 %v212_v5, %v203_v4  ;;  %v214_v17 = vadd.f32 %v212_v5, %v204_v6  ;;  %v215_v18 = vadd.f32 %v212_v5, %v205_v7  ;;  %v210_v23 = vmul.f32 %v202_v1, %v200_v15 }
  0x42   : > { %v216_v20 = vadd.f32 %v212_v5, %v206_v11  ;;  %v217_v21 = vadd.f32 %v212_v5, %v207_v12  ;;  %v218_v22 = vadd.f32 %v212_v5, %v208_v13  ;;  %v219_v24 = vadd.f32 %v212_v5, %v209_v19  ;;  %p419_p8 = por %p418_p7, %p417_p5 }
  0x43   : > { %221 = vst [vmem:[%s190_s8] sm:$0xff] %v213_v16  ;;  %222 = vst [vmem:[%s190_s8 + $0x8] sm:$0xff] %v214_v17  ;;  %v220_v25 = vadd.f32 %v212_v5, %v210_v23 }
  0x44   : > { %223 = vst [vmem:[%s190_s8 + $0x10] sm:$0xff] %v215_v18  ;;  %224 = vst [vmem:[%s190_s8 + $0x18] sm:$0xff] %v216_v20  ;;  %p420_p9 = pnand %p419_p8, %p413_p4 }
  0x45   : > { %225 = vst [vmem:[%s190_s8 + $0x20] sm:$0xff] %v217_v21  ;;  %226 = vst [vmem:[%s190_s8 + $0x28] sm:$0xff] %v218_v22 }
  0x46   : > { %227 = vst [vmem:[%s190_s8 + $0x30] sm:$0xff] %v219_v24  ;;  %228 = vst [vmem:[%s190_s8 + $0x38] sm:$0xff] %v220_v25 }
  0x47   : > { %423 = shalt.err (!%p420_p9)
}
  0x48   : > { %s424_s24 = scalar_lea.hbm %s618_s13, 1024  ;;  %s428_s30 = scalar_lea.hbm %s663_s3, 8192 }
  0x49   : > { %p425_p13 = scmp.ne.s32.totalorder %s618_s13, %s424_s24  ;;  %p429_p2 = scmp.lt.s32.totalorder %s618_s13, %s663_s3 }
  0x4a   : > { %p430_p3 = scmp.lt.s32.totalorder %s428_s30, %s424_s24 }
  0x4b   : > { %p426_p1 = pnand %p425_p13, %p672_p11 }
  0x4c   : > { %p431_p6 = por %p430_p3, %p429_p2 }
  0x4d   : > { %p427_p0 = pneg %p426_p1 }
  0x4f   : > { %p432_p10 = pnand %p431_p6, %p427_p0 }
  0x51   : > { %435 = shalt.err (!%p432_p10)
}
  0x52   : > { %s480_s11 = smov 128   ;;  %s481_s9 = smov 8  }
  0x53   : > { %334 = dma.vmem_to_hbm [thread:$0]  (%p672_p11), %s613_s10, 1024, %s618_s13, %s230_s14, %s480_s11, %s480_s11, %s481_s9  }
  0x54 PF: > { %p345_p12 = scmp.ge.s32.totalorder %s474_s19, 2  ;;  %s258_s6 = sand.u32 1, %s462_s16  }
  0x55   : > { %p673_p4 = scmp.ne.s32.totalorder %s669_s27, 0  ;;  %s259_s8 = scalar_lea.sflag [#allocation6], %s258_s6 }
  0x57   : > { %p341_p5 = pnand %p345_p12, %p673_p4 }
  0x59   : > { %p342_p7 = pneg %p341_p5 }
  0x5b   : > { %457 = dma.done.wait (%p342_p7), %s259_s8, 1024  }
  0x5c   : > { %459 = vsyncadd (%p342_p7), %s259_s8, 4294966272  ;;  %p18_p8 = scmp.ge.s32.totalorder %s533_s20, 10   ;;  %s674_s16 = smov %s466_s17 }
  0x5d   : > { %s675_s17 = smov %s470_s18  ;;  %s676_s18 = smov %s545_s23 }
  0x5e   : > { %s677_s19 = smov %s533_s20  ;;  %20 = sbr.rel (!%p18_p8) target bundleno = 8 (0x8), region = 77 }
  0x63   :  { %264 = vsyncpa [#allocation5], 1 }
  0x64   :  { %266 = vsyncpa [#allocation5 + $0x1], 1 }
  0x65   :  { %267 = vsyncpa [#allocation6], 1 }
  0x66   :  { %269 = vsyncpa [#allocation6 + $0x1], 1 }

</bundles_post_ra>
